<compile_context>
chip_gen: v5e
topology: v5e:2x2
jax: 0.10.0
libtpu: 0.0.40
codegen_flags: <defaults>
</compile_context>

<pallas_src>
import jax
import jax.numpy as jnp
from jax.experimental import pallas as pl
from jax.experimental.pallas import tpu as pltpu

IN_F = 8
OUT_F = 3

_REP = 128                       # original rows folded into one lane-dense row
_IN_D = _REP * IN_F              # 1024 -> x last dim is a multiple of 128
_OUT_D = _REP * OUT_F            # 384  -> y last dim is a multiple of 128

_XLA_MAX_ROWS = 4096             # below this: plain fused XLA, no Pallas
_SINGLE_CALL_MAX_ROWS = 262144   # up to this: one un-gridded pallas_call
_TILE_ROWS = 2048                # lane-dense rows / grid step (262144 orig rows)


# ----------------------------------------------------------------------------
# Kernel body (shared by both Pallas paths): MXU matmul + bias, f32 accumulate.
# ----------------------------------------------------------------------------
def _linear_kernel(x_ref, w_ref, b_ref, o_ref):
    # x: (TM, 1024)   w: (1024, 384) block-diagonal replicas of W^T   b: (1, 384)
    acc = jnp.dot(x_ref[...], w_ref[...], preferred_element_type=jnp.float32)
    o_ref[...] = (acc + b_ref[...]).astype(o_ref.dtype)


def _cost(rows_r, itemsize=4):
    return pl.CostEstimate(
        flops=2 * rows_r * _IN_D * _OUT_D,
        transcendentals=0,
        bytes_accessed=(rows_r * (_IN_D + _OUT_D) + _IN_D * _OUT_D + _OUT_D)
        * itemsize,
    )


def _vmem_limit(rows_per_step, buffers):
    per_step = rows_per_step * (_IN_D + _OUT_D) * 4        # x tile + y tile
    resident = (_IN_D * _OUT_D + _OUT_D) * 4               # weight + bias
    limit = buffers * per_step + resident + (4 << 20)      # + headroom
    return int(max(limit, 16 << 20))


# ----------------------------------------------------------------------------
# Mid-batch path: single invocation, no grid, everything VMEM-resident.
# ----------------------------------------------------------------------------
def _forward_single(x_r, w_block, b_block):
    rows_r = x_r.shape[0]
    return pl.pallas_call(
        _linear_kernel,
        out_shape=jax.ShapeDtypeStruct((rows_r, _OUT_D), x_r.dtype),
        in_specs=[
            pl.BlockSpec(memory_space=pltpu.MemorySpace.VMEM),
            pl.BlockSpec(memory_space=pltpu.MemorySpace.VMEM),
            pl.BlockSpec(memory_space=pltpu.MemorySpace.VMEM),
        ],
        out_specs=pl.BlockSpec(memory_space=pltpu.MemorySpace.VMEM),
        compiler_params=pltpu.CompilerParams(
            vmem_limit_bytes=_vmem_limit(rows_r, buffers=1)),
        cost_estimate=_cost(rows_r),
    )(x_r, w_block, b_block)


# ----------------------------------------------------------------------------
# Huge-batch path: tile only the lane-dense batch axis; weight/bias resident.
# ----------------------------------------------------------------------------
def _forward_tiled(x_r, w_block, b_block, tm):
    rows_r = x_r.shape[0]
    grid = (pl.cdiv(rows_r, tm),)
    return pl.pallas_call(
        _linear_kernel,
        out_shape=jax.ShapeDtypeStruct((rows_r, _OUT_D), x_r.dtype),
        grid=grid,
        in_specs=[
            pl.BlockSpec((tm, _IN_D), lambda i: (i, 0)),      # x: batch-tiled
            pl.BlockSpec((_IN_D, _OUT_D), lambda i: (0, 0)),  # w: resident
            pl.BlockSpec((1, _OUT_D), lambda i: (0, 0)),      # b: resident
        ],
        out_specs=pl.BlockSpec((tm, _OUT_D), lambda i: (i, 0)),
        compiler_params=pltpu.CompilerParams(
            dimension_semantics=("parallel",),                # megacore on v7x
            vmem_limit_bytes=_vmem_limit(tm, buffers=2),
        ),
        cost_estimate=_cost(rows_r),
    )(x_r, w_block, b_block)


# ----------------------------------------------------------------------------
# Parameter init (ALL layout plumbing hoisted here, done once).
# ----------------------------------------------------------------------------
def init_mynet_params(key, dtype=jnp.float32):
    # nn.Linear default init: uniform(-1/sqrt(in_features), 1/sqrt(in_features)).
    bound = 1.0 / (IN_F ** 0.5)
    k_w, k_b = jax.random.split(key)
    weight = jax.random.uniform(k_w, (OUT_F, IN_F), dtype, -bound, bound)  # (3, 8) torch layout
    bias = jax.random.uniform(k_b, (OUT_F,), dtype, -bound, bound)
    w_t = jnp.asarray(weight.T)                                   # (8, 3)
    # Lane-dense kernel layouts, built once:
    w_block = jnp.kron(jnp.eye(_REP, dtype=dtype), w_t)          # (1024, 384) block-diag
    b_block = jnp.tile(bias, _REP).reshape(1, _OUT_D)            # (1, 384)
    return {
        "weight": weight, "bias": bias,                           # reference checks
        "w_t": w_t, "b2": bias.reshape(1, OUT_F),                 # plain-XLA path
        "w_block": w_block, "b_block": b_block,                   # Pallas paths
    }


def mynet_forward(x, params, *, force_pallas=False, tile_rows=_TILE_ROWS):
    """x: (B, 8) f32 -> (B, 3) f32, identical to MyNet.forward."""
    batch = x.shape[0]
    if batch <= _XLA_MAX_ROWS and not force_pallas:
        # Tiny problem: a single fused XLA op beats any custom-call launch.
        return x @ params["w_t"] + params["b2"]

    # Lane-dense reshape: (B, 8) -> (ceil(B/128), 1024); zero-pad the tail.
    pad = (-batch) % _REP
    x_p = jnp.pad(x, ((0, pad), (0, 0))) if pad else x
    rows_r = (batch + pad) // _REP
    x_r = x_p.reshape(rows_r, _IN_D)

    if rows_r * _REP <= _SINGLE_CALL_MAX_ROWS:
        y_r = _forward_single(x_r, params["w_block"], params["b_block"])
    else:
        y_r = _forward_tiled(x_r, params["w_block"], params["b_block"], tile_rows)

    y = y_r.reshape(rows_r * _REP, OUT_F)
    return y[:batch] if pad else y


if __name__ == "__main__":
    key = jax.random.PRNGKey(0)
    k_params, k1, k2, k3 = jax.random.split(key, 4)
    params = init_mynet_params(k_params)

    def ref(x):
        return x @ params["weight"].T + params["bias"]

    # --- tiny batch (B = 8): plain fused XLA path (Pallas skipped by design) --
    x_small = jax.random.normal(k1, (8, IN_F), jnp.float32)
    y_small = jax.block_until_ready(mynet_forward(x_small, params))
    assert y_small.shape == (8, OUT_F)
    assert jnp.allclose(y_small, ref(x_small), atol=1e-5, rtol=1e-5)

    # --- Pallas single-invocation lane-dense path; B = 200 also exercises the
    #     pad-to-multiple-of-128 handling -------------------------------------
    x_mid = jax.random.normal(k2, (200, IN_F), jnp.float32)
    y_mid = jax.block_until_ready(mynet_forward(x_mid, params, force_pallas=True))
    assert y_mid.shape == (200, OUT_F)
    assert jnp.allclose(y_mid, ref(x_mid), atol=1e-5, rtol=1e-5)

    # --- gridded path, exercised directly at a modest size (tm=8 -> 2 steps) --
    B3 = 2048
    x_big = jax.random.normal(k3, (B3, IN_F), jnp.float32)
    x_big_r = x_big.reshape(B3 // _REP, _IN_D)
    y_big_r = jax.block_until_ready(
        _forward_tiled(x_big_r, params["w_block"], params["b_block"], tm=8))
    y_big = y_big_r.reshape(B3, OUT_F)
    assert jnp.allclose(y_big, ref(x_big), atol=1e-5, rtol=1e-5)

    print("KERNEL_OK")
</pallas_src>

<mosaic_0001>
module attributes {stable_mosaic.version = 11 : i64} {
  func.func @_linear_kernel(%arg0: memref<2x1024xf32, #tpu.memory_space<vmem>>, %arg1: memref<1024x384xf32, #tpu.memory_space<vmem>>, %arg2: memref<1x384xf32, #tpu.memory_space<vmem>>, %arg3: memref<2x384xf32, #tpu.memory_space<vmem>>) attributes {dimension_semantics = [], scalar_prefetch = 0 : i64, scratch_operands = 0 : i64, tpu.core_type = #tpu.core_type<tc>} {
    %c0 = arith.constant 0 : index
    %c0_0 = arith.constant 0 : index
    %0 = vector.load %arg0[%c0, %c0_0] : memref<2x1024xf32, #tpu.memory_space<vmem>>, vector<2x1024xf32>
    %c0_1 = arith.constant 0 : index
    %c0_2 = arith.constant 0 : index
    %1 = vector.load %arg1[%c0_1, %c0_2] : memref<1024x384xf32, #tpu.memory_space<vmem>>, vector<1024x384xf32>
    %cst = arith.constant dense<0.000000e+00> : vector<2x384xf32>
    %2 = tpu.matmul %0, %1, %cst {dimension_numbers = #tpu.dot_dimension_numbers<[1], [0], [0], [1], [0, 0, 1, 1], [], []>} : vector<2x1024xf32>, vector<1024x384xf32>, vector<2x384xf32> -> vector<2x384xf32>
    %c0_3 = arith.constant 0 : index
    %c0_4 = arith.constant 0 : index
    %3 = vector.load %arg2[%c0_3, %c0_4] : memref<1x384xf32, #tpu.memory_space<vmem>>, vector<1x384xf32>
    %4 = vector.broadcast %3 : vector<1x384xf32> to vector<2x384xf32>
    %5 = arith.addf %2, %4 : vector<2x384xf32>
    %c0_5 = arith.constant 0 : index
    %c0_6 = arith.constant 0 : index
    %6 = vector.load %arg3[%c0_5, %c0_6] : memref<2x384xf32, #tpu.memory_space<vmem>>, vector<2x384xf32>
    tpu.vector_store %arg3[%c0_5, %c0_6], %5 {strides = array<i32>} : memref<2x384xf32, #tpu.memory_space<vmem>>, vector<2x384xf32>,
    return
  }
}

</mosaic_0001>

<bundles_post_ra>
// kernel: tpu_custom_call.1
= control target key start
LH: loop header
LB: loop body
LE: loop exit
PB: predicated region body
PF: predicated region fallthrough
CT: control target
= control target key end

     0   :  { %8 = vsyncpa [#allocation3], 0  ;;  %s1168_s0 = inlined_call_operand.hbm [shape: f32[2,1024], index: 0, kind: input, shape index: {}]   ;;  %s1169_s1 = inlined_call_operand.hbm [shape: f32[1024,384], index: 1, kind: input, shape index: {}]   ;;  %s1170_s2 = inlined_call_operand.hbm [shape: f32[1,384], index: 2, kind: input, shape index: {}]   ;;  %s1171_s3 = inlined_call_operand.hbm [shape: f32[2,384], index: 3, kind: output, shape index: {}]  }
   0x1   :  { %9 = vsyncpa [#allocation6], 0  ;;  %s26_s14 = sshll.u32 %s1169_s1, 4  ;;  %s27_s14 = int_to_ptr.hbm [resolvable:$true] %s26_s14 }
   0x2   :  { %10 = vsyncpa [#allocation4], 0  ;;  %s1091_s15 = smov [#allocation5]   ;;  %s16_s19 = sshll.u32 %s1168_s0, 4  ;;  %s17_s19 = int_to_ptr.hbm [resolvable:$true] %s16_s19 }
   0x3   :  { %s28_s16 = sshll.u32 %s1091_s15, 4  ;;  %s1092_s20 = smov 384   ;;  %s29_s16 = int_to_ptr.vmem [resolvable:$true] %s28_s16 }
   0x4   :  { %s1093_s21 = smov 24   ;;  %s1094_s22 = smov [#allocation2]  }
   0x5   :  { %34 = dma.hbm_to_vmem [thread:$0]  %s27_s14, 49152, %s29_s16, [#allocation6], %s1092_s20, %s1092_s20, %s1093_s21  }
   0x6   :  { %s18_s23 = sshll.u32 %s1094_s22, 4  ;;  %s40_s26 = sshll.u32 %s1170_s2, 4  ;;  %s19_s23 = int_to_ptr.vmem [resolvable:$true] %s18_s23  ;;  %s41_s26 = int_to_ptr.hbm [resolvable:$true] %s40_s26 }
   0x7   :  { %21 = dma.hbm_to_vmem [thread:$0]  %s17_s19, 256, %s19_s23, [#allocation3]  }
   0x8   :  { %s1095_s1 = smov [#allocation7]  }
   0x9   :  { %s42_s27 = sshll.u32 %s1095_s1, 4  ;;  %s43_s27 = int_to_ptr.vmem [resolvable:$true] %s42_s27 }
   0xa   :  { %45 = dma.hbm_to_vmem [thread:$0]  %s41_s26, 48, %s43_s27, [#allocation6]  }
   0xb   :  { %1085 = dma.done.wait [#allocation3], 256  }
   0xc   :  { %1086 = vsyncadd [#allocation3], 4294967040 }
   0xd   :  { %1087 = dma.done.wait [#allocation6], 49200  }
   0xe   :  { %1088 = vsyncadd [#allocation6], 4294918096  ;;  %v201_v0 = vld [vmem:[#allocation5 + $0x468] sm:$0xff]  ;;  %v198_v2 = vld [vmem:[#allocation5 + $0x450] sm:$0xff]  ;;  %vm958_vm0 = vcmask 1041408   ;;  %s1096_s0 = smov [#allocation8]  }
   0xf   :  { %v105_v1 = vld [vmem:[#allocation5 + $0x168] sm:$0xff]  ;;  %513 = vmatpush.msra.mxu2 %v201_v0  ;;  %v102_v4 = vld [vmem:[#allocation5 + $0x150] sm:$0xff]  ;;  %v195_v6 = vld [vmem:[#allocation5 + $0x438] sm:$0xff]  ;;  %s969_s2 = sshll.u32 %s1096_s0, 4  ;;  %s971_s30 = sshll.u32 %s1171_s3, 4  ;;  %vm960_vm1 = vcmask 1043456   ;;  %s970_s2 = int_to_ptr.vmem [resolvable:$true] %s969_s2  ;;  %s972_s30 = int_to_ptr.hbm [resolvable:$true] %s971_s30 }
  0x10   :  { %473 = vmatpush.msra.mxu0 %v105_v1  ;;  %v249_v3 = vld [vmem:[#allocation5 + $0x5e8] sm:$0xff]  ;;  %v246_v7 = vld [vmem:[#allocation5 + $0x5d0] sm:$0xff]  ;;  %v99_v8 = vld [vmem:[#allocation5 + $0x138] sm:$0xff] }
  0x11   :  { %v153_v5 = vld [vmem:[#allocation5 + $0x2e8] sm:$0xff]  ;;  %533 = vmatpush.msra.mxu3 %v249_v3  ;;  %514 = vmatpush.msra.mxu2 %v198_v2  ;;  %v150_v9 = vld [vmem:[#allocation5 + $0x2d0] sm:$0xff]  ;;  %v243_v10 = vld [vmem:[#allocation5 + $0x5b8] sm:$0xff] }
  0x12   :  { %493 = vmatpush.msra.mxu1 %v153_v5  ;;  %474 = vmatpush.msra.mxu0 %v102_v4  ;;  %v192_v11 = vld [vmem:[#allocation5 + $0x420] sm:$0xff]  ;;  %v147_v13 = vld [vmem:[#allocation5 + $0x2b8] sm:$0xff]  ;;  %v189_v16 = vld [vmem:[#allocation5 + $0x408] sm:$0xff] }
  0x13   :  { %534 = vmatpush.msra.mxu3 %v246_v7  ;;  %v96_v12 = vld [vmem:[#allocation5 + $0x120] sm:$0xff]  ;;  %515 = vmatpush.msra.mxu2 %v195_v6  ;;  %v93_v17 = vld [vmem:[#allocation5 + $0x108] sm:$0xff]  ;;  %v186_v20 = vld [vmem:[#allocation5 + $0x3f0] sm:$0xff] }
  0x14   :  { %494 = vmatpush.msra.mxu1 %v150_v9  ;;  %475 = vmatpush.msra.mxu0 %v99_v8  ;;  %v240_v14 = vld [vmem:[#allocation5 + $0x5a0] sm:$0xff]  ;;  %v237_v18 = vld [vmem:[#allocation5 + $0x588] sm:$0xff]  ;;  %v90_v21 = vld [vmem:[#allocation5 + $0xf0] sm:$0xff] }
  0x15   :  { %v144_v15 = vld [vmem:[#allocation5 + $0x2a0] sm:$0xff]  ;;  %535 = vmatpush.msra.mxu3 %v243_v10  ;;  %516 = vmatpush.msra.mxu2 %v192_v11  ;;  %v141_v19 = vld [vmem:[#allocation5 + $0x288] sm:$0xff]  ;;  %v234_v22 = vld [vmem:[#allocation5 + $0x570] sm:$0xff] }
  0x16   :  { %495 = vmatpush.msra.mxu1 %v147_v13  ;;  %476 = vmatpush.msra.mxu0 %v96_v12  ;;  %v138_v23 = vld [vmem:[#allocation5 + $0x270] sm:$0xff]  ;;  %v183_v24 = vld [vmem:[#allocation5 + $0x3d8] sm:$0xff]  ;;  %v180_v28 = vld [vmem:[#allocation5 + $0x3c0] sm:$0xff] }
  0x17   :  { %536 = vmatpush.msra.mxu3 %v240_v14  ;;  %517 = vmatpush.msra.mxu2 %v189_v16  ;;  %v87_v25 = vld [vmem:[#allocation5 + $0xd8] sm:$0xff]  ;;  %v84_v29 = vld [vmem:[#allocation5 + $0xc0] sm:$0xff]  ;;  %v177_v32 = vld [vmem:[#allocation5 + $0x3a8] sm:$0xff] }
  0x18   :  { %496 = vmatpush.msra.mxu1 %v144_v15  ;;  %477 = vmatpush.msra.mxu0 %v93_v17  ;;  %v231_v26 = vld [vmem:[#allocation5 + $0x558] sm:$0xff]  ;;  %v228_v30 = vld [vmem:[#allocation5 + $0x540] sm:$0xff]  ;;  %v81_v33 = vld [vmem:[#allocation5 + $0xa8] sm:$0xff] }
  0x19   :  { %537 = vmatpush.msra.mxu3 %v237_v18  ;;  %518 = vmatpush.msra.mxu2 %v186_v20  ;;  %v135_v27 = vld [vmem:[#allocation5 + $0x258] sm:$0xff]  ;;  %v132_v31 = vld [vmem:[#allocation5 + $0x240] sm:$0xff]  ;;  %v225_v34 = vld [vmem:[#allocation5 + $0x528] sm:$0xff] }
  0x1a   :  { %497 = vmatpush.msra.mxu1 %v141_v19  ;;  %478 = vmatpush.msra.mxu0 %v90_v21  ;;  %v129_v35 = vld [vmem:[#allocation5 + $0x228] sm:$0xff]  ;;  %v174_v36 = vld [vmem:[#allocation5 + $0x390] sm:$0xff]  ;;  %v171_v40 = vld [vmem:[#allocation5 + $0x378] sm:$0xff] }
  0x1b   :  { %538 = vmatpush.msra.mxu3 %v234_v22  ;;  %519 = vmatpush.msra.mxu2 %v183_v24  ;;  %v78_v37 = vld [vmem:[#allocation5 + $0x90] sm:$0xff]  ;;  %v75_v41 = vld [vmem:[#allocation5 + $0x78] sm:$0xff]  ;;  %v168_v44 = vld [vmem:[#allocation5 + $0x360] sm:$0xff] }
  0x1c   :  { %498 = vmatpush.msra.mxu1 %v138_v23  ;;  %479 = vmatpush.msra.mxu0 %v87_v25  ;;  %v222_v38 = vld [vmem:[#allocation5 + $0x510] sm:$0xff]  ;;  %v219_v42 = vld [vmem:[#allocation5 + $0x4f8] sm:$0xff]  ;;  %v72_v45 = vld [vmem:[#allocation5 + $0x60] sm:$0xff] }
  0x1d   :  { %539 = vmatpush.msra.mxu3 %v231_v26  ;;  %520 = vmatpush.msra.mxu2 %v180_v28  ;;  %v126_v39 = vld [vmem:[#allocation5 + $0x210] sm:$0xff]  ;;  %v123_v43 = vld [vmem:[#allocation5 + $0x1f8] sm:$0xff]  ;;  %v216_v46 = vld [vmem:[#allocation5 + $0x4e0] sm:$0xff] }
  0x1e   :  { %499 = vmatpush.msra.mxu1 %v135_v27  ;;  %480 = vmatpush.msra.mxu0 %v84_v29  ;;  %v120_v47 = vld [vmem:[#allocation5 + $0x1e0] sm:$0xff]  ;;  %v165_v48 = vld [vmem:[#allocation5 + $0x348] sm:$0xff]  ;;  %v162_v52 = vld [vmem:[#allocation5 + $0x330] sm:$0xff] }
  0x1f   :  { %540 = vmatpush.msra.mxu3 %v228_v30  ;;  %521 = vmatpush.msra.mxu2 %v177_v32  ;;  %v69_v49 = vld [vmem:[#allocation5 + $0x48] sm:$0xff]  ;;  %v66_v53 = vld [vmem:[#allocation5 + $0x30] sm:$0xff]  ;;  %v159_v56 = vld [vmem:[#allocation5 + $0x318] sm:$0xff] }
  0x20   :  { %500 = vmatpush.msra.mxu1 %v132_v31  ;;  %481 = vmatpush.msra.mxu0 %v81_v33  ;;  %v213_v50 = vld [vmem:[#allocation5 + $0x4c8] sm:$0xff]  ;;  %v210_v54 = vld [vmem:[#allocation5 + $0x4b0] sm:$0xff]  ;;  %v63_v57 = vld [vmem:[#allocation5 + $0x18] sm:$0xff] }
  0x21   :  { %541 = vmatpush.msra.mxu3 %v225_v34  ;;  %522 = vmatpush.msra.mxu2 %v174_v36  ;;  %v117_v51 = vld [vmem:[#allocation5 + $0x1c8] sm:$0xff]  ;;  %v114_v55 = vld [vmem:[#allocation5 + $0x1b0] sm:$0xff]  ;;  %v207_v58 = vld [vmem:[#allocation5 + $0x498] sm:$0xff] }
  0x22   :  { %501 = vmatpush.msra.mxu1 %v129_v35  ;;  %482 = vmatpush.msra.mxu0 %v78_v37  ;;  %v111_v59 = vld [vmem:[#allocation5 + $0x198] sm:$0xff]  ;;  %v156_v60 = vld [vmem:[#allocation5 + $0x300] sm:$0xff]  ;;  %v393_v62 = vld [vmem:[#allocation5 + $0xa68] sm:$0xff] }
  0x23   :  { %542 = vmatpush.msra.mxu3 %v222_v38  ;;  %523 = vmatpush.msra.mxu2 %v171_v40  ;;  %v60_v61 = vld [vmem:[#allocation5] sm:$0xff]  ;;  %v297_v0 = vld [vmem:[#allocation5 + $0x768] sm:$0xff]  ;;  %v390_v2 = vld [vmem:[#allocation5 + $0xa50] sm:$0xff] }
  0x24   :  { %502 = vmatpush.msra.mxu1 %v126_v39  ;;  %483 = vmatpush.msra.mxu0 %v75_v41  ;;  %v204_v63 = vld [vmem:[#allocation5 + $0x480] sm:$0xff]  ;;  %v441_v1 = vld [vmem:[#allocation5 + $0xbe8] sm:$0xff]  ;;  %v294_v4 = vld [vmem:[#allocation5 + $0x750] sm:$0xff] }
  0x25   :  { %543 = vmatpush.msra.mxu3 %v219_v42  ;;  %524 = vmatpush.msra.mxu2 %v168_v44  ;;  %v108_v3 = vld [vmem:[#allocation5 + $0x180] sm:$0xff]  ;;  %v345_v5 = vld [vmem:[#allocation5 + $0x8e8] sm:$0xff]  ;;  %v387_v6 = vld [vmem:[#allocation5 + $0xa38] sm:$0xff] }
  0x26   :  { %503 = vmatpush.msra.mxu1 %v123_v43  ;;  %484 = vmatpush.msra.mxu0 %v72_v45  ;;  %v438_v7 = vld [vmem:[#allocation5 + $0xbd0] sm:$0xff]  ;;  %v291_v8 = vld [vmem:[#allocation5 + $0x738] sm:$0xff]  ;;  %v384_v10 = vld [vmem:[#allocation5 + $0xa20] sm:$0xff] }
  0x27   :  { %544 = vmatpush.msra.mxu3 %v216_v46  ;;  %525 = vmatpush.msra.mxu2 %v165_v48  ;;  %v342_v9 = vld [vmem:[#allocation5 + $0x8d0] sm:$0xff]  ;;  %v435_v11 = vld [vmem:[#allocation5 + $0xbb8] sm:$0xff]  ;;  %v288_v12 = vld [vmem:[#allocation5 + $0x720] sm:$0xff] }
  0x28   :  { %504 = vmatpush.msra.mxu1 %v120_v47  ;;  %485 = vmatpush.msra.mxu0 %v69_v49  ;;  %v339_v13 = vld [vmem:[#allocation5 + $0x8b8] sm:$0xff]  ;;  %v381_v14 = vld [vmem:[#allocation5 + $0xa08] sm:$0xff]  ;;  %v432_v15 = vld [vmem:[#allocation5 + $0xba0] sm:$0xff] }
  0x29   :  { %545 = vmatpush.msra.mxu3 %v213_v50  ;;  %526 = vmatpush.msra.mxu2 %v162_v52  ;;  %v285_v16 = vld [vmem:[#allocation5 + $0x708] sm:$0xff]  ;;  %v336_v17 = vld [vmem:[#allocation5 + $0x8a0] sm:$0xff]  ;;  %v378_v18 = vld [vmem:[#allocation5 + $0x9f0] sm:$0xff] }
  0x2a   :  { %505 = vmatpush.msra.mxu1 %v117_v51  ;;  %486 = vmatpush.msra.mxu0 %v66_v53  ;;  %v429_v19 = vld [vmem:[#allocation5 + $0xb88] sm:$0xff]  ;;  %v282_v20 = vld [vmem:[#allocation5 + $0x6f0] sm:$0xff]  ;;  %v375_v22 = vld [vmem:[#allocation5 + $0x9d8] sm:$0xff] }
  0x2b   :  { %546 = vmatpush.msra.mxu3 %v210_v54  ;;  %527 = vmatpush.msra.mxu2 %v159_v56  ;;  %v333_v21 = vld [vmem:[#allocation5 + $0x888] sm:$0xff]  ;;  %v426_v23 = vld [vmem:[#allocation5 + $0xb70] sm:$0xff]  ;;  %v279_v25 = vld [vmem:[#allocation5 + $0x6d8] sm:$0xff] }
  0x2c   :  { %506 = vmatpush.msra.mxu1 %v114_v55  ;;  %487 = vmatpush.msra.mxu0 %v63_v57  ;;  %v58_v24 = vld [vmem:[#allocation2] sm:$0xff]  ;;  %v372_v27 = vld [vmem:[#allocation5 + $0x9c0] sm:$0xff]  ;;  %v423_v28 = vld [vmem:[#allocation5 + $0xb58] sm:$0xff] }
  0x2d   :  { %547 = vmatpush.msra.mxu3 %v207_v58  ;;  %528 = vmatpush.msra.mxu2 %v156_v60  ;;  %v330_v26 = vld [vmem:[#allocation5 + $0x870] sm:$0xff]  ;;  %454 = vst [vmem:[#allocation1] ss:$4 sm:$0xff] %v58_v24  ;;  %v276_v29 = vld [vmem:[#allocation5 + $0x6c0] sm:$0xff]  ;;  %v327_v30 = vld [vmem:[#allocation5 + $0x858] sm:$0xff] }
  0x2e   :  { %507 = vmatpush.msra.mxu1 %v111_v59  ;;  %488 = vmatpush.msra.mxu0 %v60_v61  ;;  %v369_v31 = vld [vmem:[#allocation5 + $0x9a8] sm:$0xff]  ;;  %v420_v32 = vld [vmem:[#allocation5 + $0xb40] sm:$0xff]  ;;  %v366_v35 = vld [vmem:[#allocation5 + $0x990] sm:$0xff] }
  0x2f   :  { %593 = vmatpush.msrb.mxu2 %v393_v62  ;;  %548 = vmatpush.msra.mxu3 %v204_v63  ;;  %v273_v33 = vld [vmem:[#allocation5 + $0x6a8] sm:$0xff]  ;;  %v324_v34 = vld [vmem:[#allocation5 + $0x840] sm:$0xff]  ;;  %v59_v37 = vld [vmem:[#allocation2 + $0x8] sm:$0xff] }
  0x30   :  { %553 = vmatpush.msrb.mxu0 %v297_v0  ;;  %508 = vmatpush.msra.mxu1 %v108_v3  ;;  %v417_v36 = vld [vmem:[#allocation5 + $0xb28] sm:$0xff]  ;;  %v270_v38 = vld [vmem:[#allocation5 + $0x690] sm:$0xff]  ;;  %456 = vst [vmem:[#allocation1 + $0x20] ss:$4 sm:$0xff] %v59_v37  ;;  %v363_v40 = vld [vmem:[#allocation5 + $0x978] sm:$0xff] }
  0x31   :  { %613 = vmatpush.msrb.mxu3 %v441_v1  ;;  %594 = vmatpush.msrb.mxu2 %v390_v2  ;;  %v321_v39 = vld [vmem:[#allocation5 + $0x828] sm:$0xff]  ;;  %v414_v41 = vld [vmem:[#allocation5 + $0xb10] sm:$0xff]  ;;  %v267_v42 = vld [vmem:[#allocation5 + $0x678] sm:$0xff] }
  0x32   :  { %554 = vmatpush.msrb.mxu0 %v294_v4  ;;  %573 = vmatpush.msrb.mxu1 %v345_v5  ;;  %v318_v43 = vld [vmem:[#allocation5 + $0x810] sm:$0xff]  ;;  %v360_v44 = vld [vmem:[#allocation5 + $0x960] sm:$0xff]  ;;  %v411_v45 = vld [vmem:[#allocation5 + $0xaf8] sm:$0xff] }
  0x33   :  { %595 = vmatpush.msrb.mxu2 %v387_v6  ;;  %614 = vmatpush.msrb.mxu3 %v438_v7  ;;  %v264_v46 = vld [vmem:[#allocation5 + $0x660] sm:$0xff]  ;;  %v315_v47 = vld [vmem:[#allocation5 + $0x7f8] sm:$0xff]  ;;  %v357_v48 = vld [vmem:[#allocation5 + $0x948] sm:$0xff] }
  0x34   :  { %555 = vmatpush.msrb.mxu0 %v291_v8  ;;  %574 = vmatpush.msrb.mxu1 %v342_v9  ;;  %v408_v49 = vld [vmem:[#allocation5 + $0xae0] sm:$0xff]  ;;  %v261_v50 = vld [vmem:[#allocation5 + $0x648] sm:$0xff]  ;;  %v354_v52 = vld [vmem:[#allocation5 + $0x930] sm:$0xff] }
  0x35   :  { %596 = vmatpush.msrb.mxu2 %v384_v10  ;;  %615 = vmatpush.msrb.mxu3 %v435_v11  ;;  %v312_v51 = vld [vmem:[#allocation5 + $0x7e0] sm:$0xff]  ;;  %v405_v53 = vld [vmem:[#allocation5 + $0xac8] sm:$0xff]  ;;  %v258_v54 = vld [vmem:[#allocation5 + $0x630] sm:$0xff] }
  0x36   :  { %556 = vmatpush.msrb.mxu0 %v288_v12  ;;  %575 = vmatpush.msrb.mxu1 %v339_v13  ;;  %v309_v55 = vld [vmem:[#allocation5 + $0x7c8] sm:$0xff]  ;;  %v351_v56 = vld [vmem:[#allocation5 + $0x918] sm:$0xff]  ;;  %v402_v57 = vld [vmem:[#allocation5 + $0xab0] sm:$0xff] }
  0x37   :  { %597 = vmatpush.msrb.mxu2 %v381_v14  ;;  %616 = vmatpush.msrb.mxu3 %v432_v15  ;;  %v255_v58 = vld [vmem:[#allocation5 + $0x618] sm:$0xff]  ;;  %v306_v59 = vld [vmem:[#allocation5 + $0x7b0] sm:$0xff]  ;;  %v348_v60 = vld [vmem:[#allocation5 + $0x900] sm:$0xff] }
  0x38   :  { %557 = vmatpush.msrb.mxu0 %v285_v16  ;;  %576 = vmatpush.msrb.mxu1 %v336_v17  ;;  %v399_v61 = vld [vmem:[#allocation5 + $0xa98] sm:$0xff]  ;;  %v252_v63 = vld [vmem:[#allocation5 + $0x600] sm:$0xff]  ;;  %v202_v0 = vld [vmem:[#allocation5 + $0x470] sm:$0xff] }
  0x39   :  { %598 = vmatpush.msrb.mxu2 %v378_v18  ;;  %617 = vmatpush.msrb.mxu3 %v429_v19  ;;  %v1126_v62 = vld.sshfl [vmem:[#allocation1 + $0x10] sm:$0xff pattern:$0x73625140]  ;;  %v396_v2 = vld [vmem:[#allocation5 + $0xa80] sm:$0xff]  ;;  %v106_v5 = vld [vmem:[#allocation5 + $0x170] sm:$0xff] }
  0x3a   :  { %558 = vmatpush.msrb.mxu0 %v282_v20  ;;  %577 = vmatpush.msrb.mxu1 %v333_v21  ;;  %v303_v1 = vld [vmem:[#allocation5 + $0x798] sm:$0xff]  ;;  %v1128_v3 = vld.sshfl [vmem:[#allocation1] sm:$0xff pattern:$0x73625140]  ;;  %v250_v7 = vld [vmem:[#allocation5 + $0x5f0] sm:$0xff] }
  0x3b   :  { %599 = vmatpush.msrb.mxu2 %v375_v22  ;;  %618 = vmatpush.msrb.mxu3 %v426_v23  ;;  %v1131_v4 = vld.sshfl [vmem:[#allocation1 + $0x18] sm:$0xff pattern:$0x73625140]  ;;  %v199_v6 = vld [vmem:[#allocation5 + $0x458] sm:$0xff]  ;;  %v154_v12 = vld [vmem:[#allocation5 + $0x2f0] sm:$0xff] }
  0x3c   :  { %559 = vmatpush.msrb.mxu0 %v279_v25  ;;  %578 = vmatpush.msrb.mxu1 %v330_v26  ;;  %v300_v8 = vld [vmem:[#allocation5 + $0x780] sm:$0xff]  ;;  %v103_v9 = vld [vmem:[#allocation5 + $0x158] sm:$0xff]  ;;  %v1135_v10 = vld.sshfl [vmem:[#allocation1 + $0x8] sm:$0xff pattern:$0x73625140] }
  0x3d   :  { %600 = vmatpush.msrb.mxu2 %v372_v27  ;;  %619 = vmatpush.msrb.mxu3 %v423_v28  ;;  %v196_v11 = vld [vmem:[#allocation5 + $0x440] sm:$0xff]  ;;  %v247_v13 = vld [vmem:[#allocation5 + $0x5d8] sm:$0xff]  ;;  %v193_v15 = vld [vmem:[#allocation5 + $0x428] sm:$0xff] }
  0x3e   :  { %560 = vmatpush.msrb.mxu0 %v276_v29  ;;  %579 = vmatpush.msrb.mxu1 %v327_v30  ;;  %v100_v14 = vld [vmem:[#allocation5 + $0x140] sm:$0xff]  ;;  %v151_v16 = vld [vmem:[#allocation5 + $0x2d8] sm:$0xff]  ;;  %v97_v19 = vld [vmem:[#allocation5 + $0x128] sm:$0xff] }
  0x3f   :  { %601 = vmatpush.msrb.mxu2 %v369_v31  ;;  %620 = vmatpush.msrb.mxu3 %v420_v32  ;;  %v244_v17 = vld [vmem:[#allocation5 + $0x5c0] sm:$0xff]  ;;  %v1138_v18 = vld.sshfl [vmem:[#allocation1 + $0x30] sm:$0xff pattern:$0x73625140]  ;;  %v190_v21 = vld [vmem:[#allocation5 + $0x410] sm:$0xff] }
  0x40   :  { %561 = vmatpush.msrb.mxu0 %v273_v33  ;;  %580 = vmatpush.msrb.mxu1 %v324_v34  ;;  %v148_v20 = vld [vmem:[#allocation5 + $0x2c0] sm:$0xff]  ;;  %v241_v22 = vld [vmem:[#allocation5 + $0x5a8] sm:$0xff]  ;;  %v94_v25 = vld [vmem:[#allocation5 + $0x110] sm:$0xff] }
  0x41   :  { %602 = vmatpush.msrb.mxu2 %v366_v35  ;;  %621 = vmatpush.msrb.mxu3 %v417_v36  ;;  %v1140_v23 = vld.sshfl [vmem:[#allocation1 + $0x20] sm:$0xff pattern:$0x73625140]  ;;  %v1143_v24 = vld.sshfl [vmem:[#allocation1 + $0x38] sm:$0xff pattern:$0x73625140] }
  0x42   :  { %562 = vmatpush.msrb.mxu0 %v270_v38  ;;  %581 = vmatpush.msrb.mxu1 %v321_v39  ;;  %v145_v26 = vld [vmem:[#allocation5 + $0x2a8] sm:$0xff]  ;;  %v187_v27 = vld [vmem:[#allocation5 + $0x3f8] sm:$0xff]  ;;  %v238_v28 = vld [vmem:[#allocation5 + $0x590] sm:$0xff] }
  0x43   :  { %603 = vmatpush.msrb.mxu2 %v363_v40  ;;  %622 = vmatpush.msrb.mxu3 %v414_v41  ;;  %v1146_v29 = vld.sshfl [vmem:[#allocation1 + $0x28] sm:$0xff pattern:$0x73625140]  ;;  %v91_v30 = vld [vmem:[#allocation5 + $0xf8] sm:$0xff]  ;;  %v184_v32 = vld [vmem:[#allocation5 + $0x3e0] sm:$0xff] }
  0x44   :  { %563 = vmatpush.msrb.mxu0 %v267_v42  ;;  %582 = vmatpush.msrb.mxu1 %v318_v43  ;;  %v142_v31 = vld [vmem:[#allocation5 + $0x290] sm:$0xff]  ;;  %v235_v33 = vld [vmem:[#allocation5 + $0x578] sm:$0xff]  ;;  %v88_v34 = vld [vmem:[#allocation5 + $0xe0] sm:$0xff] }
  0x45   :  { %604 = vmatpush.msrb.mxu2 %v360_v44  ;;  %623 = vmatpush.msrb.mxu3 %v411_v45  ;;  %v139_v35 = vld [vmem:[#allocation5 + $0x278] sm:$0xff]  ;;  %v181_v36 = vld [vmem:[#allocation5 + $0x3c8] sm:$0xff]  ;;  %v232_v37 = vld [vmem:[#allocation5 + $0x560] sm:$0xff] }
  0x46   :  { %564 = vmatpush.msrb.mxu0 %v264_v46  ;;  %583 = vmatpush.msrb.mxu1 %v315_v47  ;;  %v85_v38 = vld [vmem:[#allocation5 + $0xc8] sm:$0xff]  ;;  %v136_v39 = vld [vmem:[#allocation5 + $0x260] sm:$0xff]  ;;  %v178_v40 = vld [vmem:[#allocation5 + $0x3b0] sm:$0xff] }
  0x47   :  { %605 = vmatpush.msrb.mxu2 %v357_v48  ;;  %624 = vmatpush.msrb.mxu3 %v408_v49  ;;  %v229_v41 = vld [vmem:[#allocation5 + $0x548] sm:$0xff]  ;;  %v82_v42 = vld [vmem:[#allocation5 + $0xb0] sm:$0xff]  ;;  %v175_v44 = vld [vmem:[#allocation5 + $0x398] sm:$0xff] }
  0x48   :  { %565 = vmatpush.msrb.mxu0 %v261_v50  ;;  %584 = vmatpush.msrb.mxu1 %v312_v51  ;;  %v133_v43 = vld [vmem:[#allocation5 + $0x248] sm:$0xff]  ;;  %v226_v45 = vld [vmem:[#allocation5 + $0x530] sm:$0xff]  ;;  %v79_v46 = vld [vmem:[#allocation5 + $0x98] sm:$0xff] }
  0x49   :  { %606 = vmatpush.msrb.mxu2 %v354_v52  ;;  %625 = vmatpush.msrb.mxu3 %v405_v53  ;;  %v130_v47 = vld [vmem:[#allocation5 + $0x230] sm:$0xff]  ;;  %v172_v48 = vld [vmem:[#allocation5 + $0x380] sm:$0xff]  ;;  %v223_v49 = vld [vmem:[#allocation5 + $0x518] sm:$0xff] }
  0x4a   :  { %566 = vmatpush.msrb.mxu0 %v258_v54  ;;  %585 = vmatpush.msrb.mxu1 %v309_v55  ;;  %v76_v50 = vld [vmem:[#allocation5 + $0x80] sm:$0xff]  ;;  %v127_v51 = vld [vmem:[#allocation5 + $0x218] sm:$0xff]  ;;  %v169_v52 = vld [vmem:[#allocation5 + $0x368] sm:$0xff] }
  0x4b   :  { %607 = vmatpush.msrb.mxu2 %v351_v56  ;;  %626 = vmatpush.msrb.mxu3 %v402_v57  ;;  %v220_v53 = vld [vmem:[#allocation5 + $0x500] sm:$0xff]  ;;  %v73_v54 = vld [vmem:[#allocation5 + $0x68] sm:$0xff]  ;;  %v166_v56 = vld [vmem:[#allocation5 + $0x350] sm:$0xff] }
  0x4c   :  { %567 = vmatpush.msrb.mxu0 %v255_v58  ;;  %586 = vmatpush.msrb.mxu1 %v306_v59  ;;  %v124_v55 = vld [vmem:[#allocation5 + $0x200] sm:$0xff]  ;;  %v217_v57 = vld [vmem:[#allocation5 + $0x4e8] sm:$0xff]  ;;  %v70_v58 = vld [vmem:[#allocation5 + $0x50] sm:$0xff] }
  0x4d   :  { %608 = vmatpush.msrb.mxu2 %v348_v60  ;;  %627 = vmatpush.msrb.mxu3 %v399_v61  ;;  %v121_v59 = vld [vmem:[#allocation5 + $0x1e8] sm:$0xff]  ;;  %v163_v60 = vld [vmem:[#allocation5 + $0x338] sm:$0xff]  ;;  %v214_v61 = vld [vmem:[#allocation5 + $0x4d0] sm:$0xff] }
  0x4e   :  { %529 = vmatmul.f32.vlgmr.msra.gmra.mxu2 %v1126_v62  ;;  %568 = vmatpush.msrb.mxu0 %v252_v63  ;;  %v67_v63 = vld [vmem:[#allocation5 + $0x38] sm:$0xff] }
  0x4f   :  { %673 = vmatpush.msra.mxu2 %v202_v0  ;;  %587 = vmatpush.msrb.mxu1 %v303_v1  ;;  %v118_v0 = vld [vmem:[#allocation5 + $0x1d0] sm:$0xff]  ;;  %v160_v1 = vld [vmem:[#allocation5 + $0x320] sm:$0xff] }
  0x50   :  { %628 = vmatpush.msrb.mxu3 %v396_v2  ;;  %489 = vmatmul.f32.vlgmr.msra.gmra.mxu0 %v1128_v3  ;;  %v211_v2 = vld [vmem:[#allocation5 + $0x4b8] sm:$0xff] }
  0x51   :  { %549 = vmatmul.f32.vlgmr.msra.gmra.mxu3 %v1131_v4  ;;  %633 = vmatpush.msra.mxu0 %v106_v5  ;;  %v64_v5 = vld [vmem:[#allocation5 + $0x20] sm:$0xff] }
  0x52   :  { %674 = vmatpush.msra.mxu2 %v199_v6  ;;  %693 = vmatpush.msra.mxu3 %v250_v7  ;;  %v115_v6 = vld [vmem:[#allocation5 + $0x1b8] sm:$0xff]  ;;  %v157_v7 = vld [vmem:[#allocation5 + $0x308] sm:$0xff] }
  0x53   :  { %588 = vmatpush.msrb.mxu1 %v300_v8  ;;  %634 = vmatpush.msra.mxu0 %v103_v9  ;;  %v208_v8 = vld [vmem:[#allocation5 + $0x4a0] sm:$0xff]  ;;  %v394_v9 = vld [vmem:[#allocation5 + $0xa70] sm:$0xff] }
  0x54   :  { %509 = vmatmul.f32.vlgmr.msra.gmra.mxu1 %v1135_v10  ;;  %675 = vmatpush.msra.mxu2 %v196_v11  ;;  %v61_v11 = vld [vmem:[#allocation5 + $0x8] sm:$0xff] }
  0x55   :  { %653 = vmatpush.msra.mxu1 %v154_v12  ;;  %694 = vmatpush.msra.mxu3 %v247_v13  ;;  %v112_v12 = vld [vmem:[#allocation5 + $0x1a0] sm:$0xff]  ;;  %v205_v13 = vld [vmem:[#allocation5 + $0x488] sm:$0xff] }
  0x56   :  { %635 = vmatpush.msra.mxu0 %v100_v14  ;;  %676 = vmatpush.msra.mxu2 %v193_v15  ;;  %v298_v14 = vld [vmem:[#allocation5 + $0x770] sm:$0xff]  ;;  %v391_v15 = vld [vmem:[#allocation5 + $0xa58] sm:$0xff] }
  0x57   :  { %654 = vmatpush.msra.mxu1 %v151_v16  ;;  %695 = vmatpush.msra.mxu3 %v244_v17  ;;  %v442_v16 = vld [vmem:[#allocation5 + $0xbf0] sm:$0xff]  ;;  %v109_v17 = vld [vmem:[#allocation5 + $0x188] sm:$0xff] }
  0x58   :  { %609 = vmatmul.f32.vlgmr.msrb.gmra.mxu2 %v1138_v18  ;;  %636 = vmatpush.msra.mxu0 %v97_v19  ;;  %v295_v19 = vld [vmem:[#allocation5 + $0x758] sm:$0xff] }
  0x59   :  { %655 = vmatpush.msra.mxu1 %v148_v20  ;;  %677 = vmatpush.msra.mxu2 %v190_v21  ;;  %v346_v20 = vld [vmem:[#allocation5 + $0x8f0] sm:$0xff]  ;;  %v388_v21 = vld [vmem:[#allocation5 + $0xa40] sm:$0xff] }
  0x5a   :  { %696 = vmatpush.msra.mxu3 %v241_v22  ;;  %569 = vmatmul.f32.vlgmr.msrb.gmra.mxu0 %v1140_v23  ;;  %v439_v22 = vld [vmem:[#allocation5 + $0xbd8] sm:$0xff] }
  0x5b   :  { %629 = vmatmul.f32.vlgmr.msrb.gmra.mxu3 %v1143_v24  ;;  %637 = vmatpush.msra.mxu0 %v94_v25  ;;  %v292_v25 = vld [vmem:[#allocation5 + $0x740] sm:$0xff] }
  0x5c   :  { %656 = vmatpush.msra.mxu1 %v145_v26  ;;  %678 = vmatpush.msra.mxu2 %v187_v27  ;;  %v343_v26 = vld [vmem:[#allocation5 + $0x8d8] sm:$0xff]  ;;  %v385_v27 = vld [vmem:[#allocation5 + $0xa28] sm:$0xff] }
  0x5d   :  { %697 = vmatpush.msra.mxu3 %v238_v28  ;;  %589 = vmatmul.f32.vlgmr.msrb.gmra.mxu1 %v1146_v29  ;;  %v436_v28 = vld [vmem:[#allocation5 + $0xbc0] sm:$0xff] }
  0x5e   :  { %638 = vmatpush.msra.mxu0 %v91_v30  ;;  %657 = vmatpush.msra.mxu1 %v142_v31  ;;  %v289_v30 = vld [vmem:[#allocation5 + $0x728] sm:$0xff]  ;;  %v340_v31 = vld [vmem:[#allocation5 + $0x8c0] sm:$0xff] }
  0x5f   :  { %679 = vmatpush.msra.mxu2 %v184_v32  ;;  %698 = vmatpush.msra.mxu3 %v235_v33  ;;  %v382_v32 = vld [vmem:[#allocation5 + $0xa10] sm:$0xff]  ;;  %v433_v33 = vld [vmem:[#allocation5 + $0xba8] sm:$0xff] }
  0x60   :  { %639 = vmatpush.msra.mxu0 %v88_v34  ;;  %658 = vmatpush.msra.mxu1 %v139_v35  ;;  %v286_v34 = vld [vmem:[#allocation5 + $0x710] sm:$0xff]  ;;  %v337_v35 = vld [vmem:[#allocation5 + $0x8a8] sm:$0xff] }
  0x61   :  { %680 = vmatpush.msra.mxu2 %v181_v36  ;;  %699 = vmatpush.msra.mxu3 %v232_v37  ;;  %v379_v36 = vld [vmem:[#allocation5 + $0x9f8] sm:$0xff]  ;;  %v430_v37 = vld [vmem:[#allocation5 + $0xb90] sm:$0xff] }
  0x62   :  { %640 = vmatpush.msra.mxu0 %v85_v38  ;;  %659 = vmatpush.msra.mxu1 %v136_v39  ;;  %v283_v38 = vld [vmem:[#allocation5 + $0x6f8] sm:$0xff]  ;;  %v334_v39 = vld [vmem:[#allocation5 + $0x890] sm:$0xff] }
  0x63   :  { %681 = vmatpush.msra.mxu2 %v178_v40  ;;  %700 = vmatpush.msra.mxu3 %v229_v41  ;;  %v376_v40 = vld [vmem:[#allocation5 + $0x9e0] sm:$0xff]  ;;  %v427_v41 = vld [vmem:[#allocation5 + $0xb78] sm:$0xff] }
  0x64   :  { %641 = vmatpush.msra.mxu0 %v82_v42  ;;  %660 = vmatpush.msra.mxu1 %v133_v43  ;;  %v280_v42 = vld [vmem:[#allocation5 + $0x6e0] sm:$0xff]  ;;  %v331_v43 = vld [vmem:[#allocation5 + $0x878] sm:$0xff] }
  0x65   :  { %682 = vmatpush.msra.mxu2 %v175_v44  ;;  %701 = vmatpush.msra.mxu3 %v226_v45  ;;  %v373_v44 = vld [vmem:[#allocation5 + $0x9c8] sm:$0xff]  ;;  %v424_v45 = vld [vmem:[#allocation5 + $0xb60] sm:$0xff] }
  0x66   :  { %642 = vmatpush.msra.mxu0 %v79_v46  ;;  %661 = vmatpush.msra.mxu1 %v130_v47  ;;  %v277_v46 = vld [vmem:[#allocation5 + $0x6c8] sm:$0xff]  ;;  %v328_v47 = vld [vmem:[#allocation5 + $0x860] sm:$0xff] }
  0x67   :  { %683 = vmatpush.msra.mxu2 %v172_v48  ;;  %702 = vmatpush.msra.mxu3 %v223_v49  ;;  %v370_v48 = vld [vmem:[#allocation5 + $0x9b0] sm:$0xff]  ;;  %v421_v49 = vld [vmem:[#allocation5 + $0xb48] sm:$0xff] }
  0x68   :  { %643 = vmatpush.msra.mxu0 %v76_v50  ;;  %662 = vmatpush.msra.mxu1 %v127_v51  ;;  %v274_v50 = vld [vmem:[#allocation5 + $0x6b0] sm:$0xff]  ;;  %v325_v51 = vld [vmem:[#allocation5 + $0x848] sm:$0xff] }
  0x69   :  { %684 = vmatpush.msra.mxu2 %v169_v52  ;;  %703 = vmatpush.msra.mxu3 %v220_v53  ;;  %v367_v52 = vld [vmem:[#allocation5 + $0x998] sm:$0xff]  ;;  %v418_v53 = vld [vmem:[#allocation5 + $0xb30] sm:$0xff] }
  0x6a   :  { %644 = vmatpush.msra.mxu0 %v73_v54  ;;  %663 = vmatpush.msra.mxu1 %v124_v55  ;;  %v271_v54 = vld [vmem:[#allocation5 + $0x698] sm:$0xff]  ;;  %v322_v55 = vld [vmem:[#allocation5 + $0x830] sm:$0xff] }
  0x6b   :  { %685 = vmatpush.msra.mxu2 %v166_v56  ;;  %704 = vmatpush.msra.mxu3 %v217_v57  ;;  %v364_v56 = vld [vmem:[#allocation5 + $0x980] sm:$0xff]  ;;  %v415_v57 = vld [vmem:[#allocation5 + $0xb18] sm:$0xff] }
  0x6c   :  { %645 = vmatpush.msra.mxu0 %v70_v58  ;;  %664 = vmatpush.msra.mxu1 %v121_v59  ;;  %v268_v58 = vld [vmem:[#allocation5 + $0x680] sm:$0xff]  ;;  %v319_v59 = vld [vmem:[#allocation5 + $0x818] sm:$0xff] }
  0x6d   :  { %686 = vmatpush.msra.mxu2 %v163_v60  ;;  %705 = vmatpush.msra.mxu3 %v214_v61  ;;  %v361_v60 = vld [vmem:[#allocation5 + $0x968] sm:$0xff]  ;;  %v412_v61 = vld [vmem:[#allocation5 + $0xb00] sm:$0xff] }
  0x6e   :  { %646 = vmatpush.msra.mxu0 %v67_v63  ;;  %665 = vmatpush.msra.mxu1 %v118_v0  ;;  %v265_v63 = vld [vmem:[#allocation5 + $0x668] sm:$0xff]  ;;  %v316_v0 = vld [vmem:[#allocation5 + $0x800] sm:$0xff] }
  0x6f   :  { %687 = vmatpush.msra.mxu2 %v160_v1  ;;  %706 = vmatpush.msra.mxu3 %v211_v2  ;;  %v358_v1 = vld [vmem:[#allocation5 + $0x950] sm:$0xff]  ;;  %v409_v2 = vld [vmem:[#allocation5 + $0xae8] sm:$0xff] }
  0x70   :  { %647 = vmatpush.msra.mxu0 %v64_v5  ;;  %666 = vmatpush.msra.mxu1 %v115_v6  ;;  %v262_v5 = vld [vmem:[#allocation5 + $0x650] sm:$0xff]  ;;  %v313_v6 = vld [vmem:[#allocation5 + $0x7e8] sm:$0xff] }
  0x71   :  { %688 = vmatpush.msra.mxu2 %v157_v7  ;;  %707 = vmatpush.msra.mxu3 %v208_v8  ;;  %v355_v7 = vld [vmem:[#allocation5 + $0x938] sm:$0xff]  ;;  %v406_v8 = vld [vmem:[#allocation5 + $0xad0] sm:$0xff] }
  0x72   :  { %648 = vmatpush.msra.mxu0 %v61_v11  ;;  %667 = vmatpush.msra.mxu1 %v112_v12  ;;  %v310_v11 = vld [vmem:[#allocation5 + $0x7d0] sm:$0xff]  ;;  %v352_v12 = vld [vmem:[#allocation5 + $0x920] sm:$0xff] }
  0x73   :  { %753 = vmatpush.msrb.mxu2 %v394_v9  ;;  %708 = vmatpush.msra.mxu3 %v205_v13  ;;  %v259_v9 = vld [vmem:[#allocation5 + $0x638] sm:$0xff] }
  0x74   :  { %713 = vmatpush.msrb.mxu0 %v298_v14  ;;  %668 = vmatpush.msra.mxu1 %v109_v17  ;;  %v403_v13 = vld [vmem:[#allocation5 + $0xab8] sm:$0xff]  ;;  %v253_v17 = vld [vmem:[#allocation5 + $0x608] sm:$0xff] }
  0x75   :  { %754 = vmatpush.msrb.mxu2 %v391_v15  ;;  %773 = vmatpush.msrb.mxu3 %v442_v16  ;;  %v307_v14 = vld [vmem:[#allocation5 + $0x7b8] sm:$0xff]  ;;  %v349_v15 = vld [vmem:[#allocation5 + $0x908] sm:$0xff]  ;;  %v400_v16 = vld [vmem:[#allocation5 + $0xaa0] sm:$0xff] }
  0x76   :  { %714 = vmatpush.msrb.mxu0 %v295_v19  ;;  %733 = vmatpush.msrb.mxu1 %v346_v20  ;;  %v203_v19 = vld [vmem:[#allocation5 + $0x478] sm:$0xff]  ;;  %v304_v20 = vld [vmem:[#allocation5 + $0x7a0] sm:$0xff] }
  0x77   :  { %755 = vmatpush.msrb.mxu2 %v388_v21  ;;  %774 = vmatpush.msrb.mxu3 %v439_v22  ;;  %v397_v21 = vld [vmem:[#allocation5 + $0xa88] sm:$0xff]  ;;  %v107_v22 = vld [vmem:[#allocation5 + $0x178] sm:$0xff] }
  0x78   :  { %715 = vmatpush.msrb.mxu0 %v292_v25  ;;  %734 = vmatpush.msrb.mxu1 %v343_v26  ;;  %v200_v25 = vld [vmem:[#allocation5 + $0x460] sm:$0xff]  ;;  %v251_v26 = vld [vmem:[#allocation5 + $0x5f8] sm:$0xff] }
  0x79   :  { %756 = vmatpush.msrb.mxu2 %v385_v27  ;;  %775 = vmatpush.msrb.mxu3 %v436_v28  ;;  %v301_v27 = vld [vmem:[#allocation5 + $0x788] sm:$0xff]  ;;  %v104_v28 = vld [vmem:[#allocation5 + $0x160] sm:$0xff] }
  0x7a   :  { %716 = vmatpush.msrb.mxu0 %v289_v30  ;;  %735 = vmatpush.msrb.mxu1 %v340_v31  ;;  %v197_v30 = vld [vmem:[#allocation5 + $0x448] sm:$0xff]  ;;  %v155_v31 = vld [vmem:[#allocation5 + $0x2f8] sm:$0xff] }
  0x7b   :  { %757 = vmatpush.msrb.mxu2 %v382_v32  ;;  %776 = vmatpush.msrb.mxu3 %v433_v33  ;;  %v248_v32 = vld [vmem:[#allocation5 + $0x5e0] sm:$0xff]  ;;  %v101_v33 = vld [vmem:[#allocation5 + $0x148] sm:$0xff] }
  0x7c   :  { %717 = vmatpush.msrb.mxu0 %v286_v34  ;;  %736 = vmatpush.msrb.mxu1 %v337_v35  ;;  %v194_v34 = vld [vmem:[#allocation5 + $0x430] sm:$0xff]  ;;  %v152_v35 = vld [vmem:[#allocation5 + $0x2e0] sm:$0xff] }
  0x7d   :  { %758 = vmatpush.msrb.mxu2 %v379_v36  ;;  %777 = vmatpush.msrb.mxu3 %v430_v37  ;;  %v245_v36 = vld [vmem:[#allocation5 + $0x5c8] sm:$0xff]  ;;  %v98_v37 = vld [vmem:[#allocation5 + $0x130] sm:$0xff] }
  0x7e   :  { %718 = vmatpush.msrb.mxu0 %v283_v38  ;;  %737 = vmatpush.msrb.mxu1 %v334_v39  ;;  %v191_v38 = vld [vmem:[#allocation5 + $0x418] sm:$0xff]  ;;  %v149_v39 = vld [vmem:[#allocation5 + $0x2c8] sm:$0xff] }
  0x7f   :  { %759 = vmatpush.msrb.mxu2 %v376_v40  ;;  %778 = vmatpush.msrb.mxu3 %v427_v41  ;;  %v242_v40 = vld [vmem:[#allocation5 + $0x5b0] sm:$0xff]  ;;  %v95_v41 = vld [vmem:[#allocation5 + $0x118] sm:$0xff] }
  0x80   :  { %719 = vmatpush.msrb.mxu0 %v280_v42  ;;  %738 = vmatpush.msrb.mxu1 %v331_v43  ;;  %v188_v42 = vld [vmem:[#allocation5 + $0x400] sm:$0xff]  ;;  %v146_v43 = vld [vmem:[#allocation5 + $0x2b0] sm:$0xff] }
  0x81   :  { %760 = vmatpush.msrb.mxu2 %v373_v44  ;;  %779 = vmatpush.msrb.mxu3 %v424_v45  ;;  %v239_v44 = vld [vmem:[#allocation5 + $0x598] sm:$0xff]  ;;  %v92_v45 = vld [vmem:[#allocation5 + $0x100] sm:$0xff] }
  0x82   :  { %720 = vmatpush.msrb.mxu0 %v277_v46  ;;  %739 = vmatpush.msrb.mxu1 %v328_v47  ;;  %v185_v46 = vld [vmem:[#allocation5 + $0x3e8] sm:$0xff]  ;;  %v143_v47 = vld [vmem:[#allocation5 + $0x298] sm:$0xff] }
  0x83   :  { %761 = vmatpush.msrb.mxu2 %v370_v48  ;;  %780 = vmatpush.msrb.mxu3 %v421_v49  ;;  %v236_v48 = vld [vmem:[#allocation5 + $0x580] sm:$0xff]  ;;  %v89_v49 = vld [vmem:[#allocation5 + $0xe8] sm:$0xff] }
  0x84   :  { %721 = vmatpush.msrb.mxu0 %v274_v50  ;;  %740 = vmatpush.msrb.mxu1 %v325_v51  ;;  %v182_v50 = vld [vmem:[#allocation5 + $0x3d0] sm:$0xff]  ;;  %v140_v51 = vld [vmem:[#allocation5 + $0x280] sm:$0xff] }
  0x85   :  { %762 = vmatpush.msrb.mxu2 %v367_v52  ;;  %781 = vmatpush.msrb.mxu3 %v418_v53  ;;  %v233_v52 = vld [vmem:[#allocation5 + $0x568] sm:$0xff]  ;;  %v86_v53 = vld [vmem:[#allocation5 + $0xd0] sm:$0xff] }
  0x86   :  { %722 = vmatpush.msrb.mxu0 %v271_v54  ;;  %741 = vmatpush.msrb.mxu1 %v322_v55  ;;  %v179_v54 = vld [vmem:[#allocation5 + $0x3b8] sm:$0xff]  ;;  %v137_v55 = vld [vmem:[#allocation5 + $0x268] sm:$0xff] }
  0x87   :  { %763 = vmatpush.msrb.mxu2 %v364_v56  ;;  %782 = vmatpush.msrb.mxu3 %v415_v57  ;;  %v230_v56 = vld [vmem:[#allocation5 + $0x550] sm:$0xff]  ;;  %v83_v57 = vld [vmem:[#allocation5 + $0xb8] sm:$0xff] }
  0x88   :  { %723 = vmatpush.msrb.mxu0 %v268_v58  ;;  %742 = vmatpush.msrb.mxu1 %v319_v59  ;;  %v176_v58 = vld [vmem:[#allocation5 + $0x3a0] sm:$0xff]  ;;  %v134_v59 = vld [vmem:[#allocation5 + $0x250] sm:$0xff] }
  0x89   :  { %764 = vmatpush.msrb.mxu2 %v361_v60  ;;  %783 = vmatpush.msrb.mxu3 %v412_v61  ;;  %v227_v60 = vld [vmem:[#allocation5 + $0x538] sm:$0xff]  ;;  %v80_v61 = vld [vmem:[#allocation5 + $0xa0] sm:$0xff] }
  0x8a   :  { %689 = vmatmul.f32.vlgmr.msra.gmra.mxu2 %v1126_v62  ;;  %724 = vmatpush.msrb.mxu0 %v265_v63  ;;  %v256_v62 = vld [vmem:[#allocation5 + $0x620] sm:$0xff]  ;;  %v173_v63 = vld [vmem:[#allocation5 + $0x388] sm:$0xff] }
  0x8b   :  { %743 = vmatpush.msrb.mxu1 %v316_v0  ;;  %765 = vmatpush.msrb.mxu2 %v358_v1  ;;  %v131_v0 = vld [vmem:[#allocation5 + $0x238] sm:$0xff]  ;;  %v224_v1 = vld [vmem:[#allocation5 + $0x520] sm:$0xff] }
  0x8c   :  { %784 = vmatpush.msrb.mxu3 %v409_v2  ;;  %649 = vmatmul.f32.vlgmr.msra.gmra.mxu0 %v1128_v3  ;;  %v77_v2 = vld [vmem:[#allocation5 + $0x88] sm:$0xff] }
  0x8d   :  { %709 = vmatmul.f32.vlgmr.msra.gmra.mxu3 %v1131_v4  ;;  %725 = vmatpush.msrb.mxu0 %v262_v5  ;;  %v170_v5 = vld [vmem:[#allocation5 + $0x370] sm:$0xff] }
  0x8e   :  { %744 = vmatpush.msrb.mxu1 %v313_v6  ;;  %766 = vmatpush.msrb.mxu2 %v355_v7  ;;  %v128_v6 = vld [vmem:[#allocation5 + $0x220] sm:$0xff]  ;;  %v221_v7 = vld [vmem:[#allocation5 + $0x508] sm:$0xff] }
  0x8f   :  { %785 = vmatpush.msrb.mxu3 %v406_v8  ;;  %669 = vmatmul.f32.vlgmr.msra.gmra.mxu1 %v1135_v10  ;;  %v74_v8 = vld [vmem:[#allocation5 + $0x70] sm:$0xff] }
  0x90   :  { %726 = vmatpush.msrb.mxu0 %v259_v9  ;;  %745 = vmatpush.msrb.mxu1 %v310_v11  ;;  %v167_v9 = vld [vmem:[#allocation5 + $0x358] sm:$0xff]  ;;  %v125_v11 = vld [vmem:[#allocation5 + $0x208] sm:$0xff] }
  0x91   :  { %767 = vmatpush.msrb.mxu2 %v352_v12  ;;  %786 = vmatpush.msrb.mxu3 %v403_v13  ;;  %v218_v12 = vld [vmem:[#allocation5 + $0x4f0] sm:$0xff]  ;;  %v71_v13 = vld [vmem:[#allocation5 + $0x58] sm:$0xff] }
  0x92   :  { %727 = vmatpush.msrb.mxu0 %v256_v62  ;;  %746 = vmatpush.msrb.mxu1 %v307_v14  ;;  %v164_v62 = vld [vmem:[#allocation5 + $0x340] sm:$0xff]  ;;  %v122_v14 = vld [vmem:[#allocation5 + $0x1f0] sm:$0xff] }
  0x93   :  { %768 = vmatpush.msrb.mxu2 %v349_v15  ;;  %787 = vmatpush.msrb.mxu3 %v400_v16  ;;  %v215_v15 = vld [vmem:[#allocation5 + $0x4d8] sm:$0xff]  ;;  %v68_v16 = vld [vmem:[#allocation5 + $0x40] sm:$0xff] }
  0x94   :  { %769 = vmatmul.f32.vlgmr.msrb.gmra.mxu2 %v1138_v18  ;;  %728 = vmatpush.msrb.mxu0 %v253_v17  ;;  %v161_v17 = vld [vmem:[#allocation5 + $0x328] sm:$0xff] }
  0x95   :  { %833 = vmatpush.msra.mxu2 %v203_v19  ;;  %747 = vmatpush.msrb.mxu1 %v304_v20  ;;  %v119_v19 = vld [vmem:[#allocation5 + $0x1d8] sm:$0xff]  ;;  %v212_v20 = vld [vmem:[#allocation5 + $0x4c0] sm:$0xff] }
  0x96   :  { %788 = vmatpush.msrb.mxu3 %v397_v21  ;;  %729 = vmatmul.f32.vlgmr.msrb.gmra.mxu0 %v1140_v23  ;;  %v65_v21 = vld [vmem:[#allocation5 + $0x28] sm:$0xff] }
  0x97   :  { %789 = vmatmul.f32.vlgmr.msrb.gmra.mxu3 %v1143_v24  ;;  %793 = vmatpush.msra.mxu0 %v107_v22  ;;  %v158_v22 = vld [vmem:[#allocation5 + $0x310] sm:$0xff] }
  0x98   :  { %834 = vmatpush.msra.mxu2 %v200_v25  ;;  %853 = vmatpush.msra.mxu3 %v251_v26  ;;  %v116_v25 = vld [vmem:[#allocation5 + $0x1c0] sm:$0xff]  ;;  %v209_v26 = vld [vmem:[#allocation5 + $0x4a8] sm:$0xff] }
  0x99   :  { %748 = vmatpush.msrb.mxu1 %v301_v27  ;;  %794 = vmatpush.msra.mxu0 %v104_v28  ;;  %v395_v27 = vld [vmem:[#allocation5 + $0xa78] sm:$0xff]  ;;  %v62_v28 = vld [vmem:[#allocation5 + $0x10] sm:$0xff] }
  0x9a   :  { %749 = vmatmul.f32.vlgmr.msrb.gmra.mxu1 %v1146_v29  ;;  %835 = vmatpush.msra.mxu2 %v197_v30  ;;  %v113_v30 = vld [vmem:[#allocation5 + $0x1a8] sm:$0xff] }
  0x9b   :  { %813 = vmatpush.msra.mxu1 %v155_v31  ;;  %854 = vmatpush.msra.mxu3 %v248_v32  ;;  %v206_v31 = vld [vmem:[#allocation5 + $0x490] sm:$0xff]  ;;  %v299_v32 = vld [vmem:[#allocation5 + $0x778] sm:$0xff] }
  0x9c   :  { %795 = vmatpush.msra.mxu0 %v101_v33  ;;  %836 = vmatpush.msra.mxu2 %v194_v34  ;;  %v392_v33 = vld [vmem:[#allocation5 + $0xa60] sm:$0xff]  ;;  %v443_v34 = vld [vmem:[#allocation5 + $0xbf8] sm:$0xff] }
  0x9d   :  { %814 = vmatpush.msra.mxu1 %v152_v35  ;;  %855 = vmatpush.msra.mxu3 %v245_v36  ;;  %v110_v35 = vld [vmem:[#allocation5 + $0x190] sm:$0xff]  ;;  %v296_v36 = vld [vmem:[#allocation5 + $0x760] sm:$0xff] }
  0x9e   :  { %796 = vmatpush.msra.mxu0 %v98_v37  ;;  %837 = vmatpush.msra.mxu2 %v191_v38  ;;  %v347_v37 = vld [vmem:[#allocation5 + $0x8f8] sm:$0xff]  ;;  %v389_v38 = vld [vmem:[#allocation5 + $0xa48] sm:$0xff] }
  0x9f   :  { %815 = vmatpush.msra.mxu1 %v149_v39  ;;  %856 = vmatpush.msra.mxu3 %v242_v40  ;;  %v440_v39 = vld [vmem:[#allocation5 + $0xbe0] sm:$0xff]  ;;  %v293_v40 = vld [vmem:[#allocation5 + $0x748] sm:$0xff] }
  0xa0   :  { %797 = vmatpush.msra.mxu0 %v95_v41  ;;  %838 = vmatpush.msra.mxu2 %v188_v42  ;;  %v344_v41 = vld [vmem:[#allocation5 + $0x8e0] sm:$0xff]  ;;  %v386_v42 = vld [vmem:[#allocation5 + $0xa30] sm:$0xff] }
  0xa1   :  { %816 = vmatpush.msra.mxu1 %v146_v43  ;;  %857 = vmatpush.msra.mxu3 %v239_v44  ;;  %v437_v43 = vld [vmem:[#allocation5 + $0xbc8] sm:$0xff]  ;;  %v290_v44 = vld [vmem:[#allocation5 + $0x730] sm:$0xff] }
  0xa2   :  { %798 = vmatpush.msra.mxu0 %v92_v45  ;;  %839 = vmatpush.msra.mxu2 %v185_v46  ;;  %v341_v45 = vld [vmem:[#allocation5 + $0x8c8] sm:$0xff]  ;;  %v383_v46 = vld [vmem:[#allocation5 + $0xa18] sm:$0xff] }
  0xa3   :  { %817 = vmatpush.msra.mxu1 %v143_v47  ;;  %858 = vmatpush.msra.mxu3 %v236_v48  ;;  %v434_v47 = vld [vmem:[#allocation5 + $0xbb0] sm:$0xff]  ;;  %v287_v48 = vld [vmem:[#allocation5 + $0x718] sm:$0xff] }
  0xa4   :  { %799 = vmatpush.msra.mxu0 %v89_v49  ;;  %840 = vmatpush.msra.mxu2 %v182_v50  ;;  %v338_v49 = vld [vmem:[#allocation5 + $0x8b0] sm:$0xff]  ;;  %v380_v50 = vld [vmem:[#allocation5 + $0xa00] sm:$0xff] }
  0xa5   :  { %818 = vmatpush.msra.mxu1 %v140_v51  ;;  %859 = vmatpush.msra.mxu3 %v233_v52  ;;  %v431_v51 = vld [vmem:[#allocation5 + $0xb98] sm:$0xff]  ;;  %v284_v52 = vld [vmem:[#allocation5 + $0x700] sm:$0xff] }
  0xa6   :  { %800 = vmatpush.msra.mxu0 %v86_v53  ;;  %841 = vmatpush.msra.mxu2 %v179_v54  ;;  %v335_v53 = vld [vmem:[#allocation5 + $0x898] sm:$0xff]  ;;  %v377_v54 = vld [vmem:[#allocation5 + $0x9e8] sm:$0xff] }
  0xa7   :  { %819 = vmatpush.msra.mxu1 %v137_v55  ;;  %860 = vmatpush.msra.mxu3 %v230_v56  ;;  %v428_v55 = vld [vmem:[#allocation5 + $0xb80] sm:$0xff]  ;;  %v281_v56 = vld [vmem:[#allocation5 + $0x6e8] sm:$0xff] }
  0xa8   :  { %801 = vmatpush.msra.mxu0 %v83_v57  ;;  %842 = vmatpush.msra.mxu2 %v176_v58  ;;  %v332_v57 = vld [vmem:[#allocation5 + $0x880] sm:$0xff]  ;;  %v374_v58 = vld [vmem:[#allocation5 + $0x9d0] sm:$0xff] }
  0xa9   :  { %820 = vmatpush.msra.mxu1 %v134_v59  ;;  %861 = vmatpush.msra.mxu3 %v227_v60  ;;  %v425_v59 = vld [vmem:[#allocation5 + $0xb68] sm:$0xff]  ;;  %v278_v60 = vld [vmem:[#allocation5 + $0x6d0] sm:$0xff] }
  0xaa   :  { %802 = vmatpush.msra.mxu0 %v80_v61  ;;  %843 = vmatpush.msra.mxu2 %v173_v63  ;;  %v329_v61 = vld [vmem:[#allocation5 + $0x868] sm:$0xff]  ;;  %v371_v63 = vld [vmem:[#allocation5 + $0x9b8] sm:$0xff] }
  0xab   :  { %821 = vmatpush.msra.mxu1 %v131_v0  ;;  %862 = vmatpush.msra.mxu3 %v224_v1  ;;  %v422_v0 = vld [vmem:[#allocation5 + $0xb50] sm:$0xff]  ;;  %v275_v1 = vld [vmem:[#allocation5 + $0x6b8] sm:$0xff] }
  0xac   :  { %803 = vmatpush.msra.mxu0 %v77_v2  ;;  %844 = vmatpush.msra.mxu2 %v170_v5  ;;  %v326_v2 = vld [vmem:[#allocation5 + $0x850] sm:$0xff]  ;;  %v368_v5 = vld [vmem:[#allocation5 + $0x9a0] sm:$0xff] }
  0xad   :  { %822 = vmatpush.msra.mxu1 %v128_v6  ;;  %863 = vmatpush.msra.mxu3 %v221_v7  ;;  %v419_v6 = vld [vmem:[#allocation5 + $0xb38] sm:$0xff]  ;;  %v272_v7 = vld [vmem:[#allocation5 + $0x6a0] sm:$0xff] }
  0xae   :  { %804 = vmatpush.msra.mxu0 %v74_v8  ;;  %845 = vmatpush.msra.mxu2 %v167_v9  ;;  %v323_v8 = vld [vmem:[#allocation5 + $0x838] sm:$0xff]  ;;  %v365_v9 = vld [vmem:[#allocation5 + $0x988] sm:$0xff] }
  0xaf   :  { %823 = vmatpush.msra.mxu1 %v125_v11  ;;  %864 = vmatpush.msra.mxu3 %v218_v12  ;;  %v416_v11 = vld [vmem:[#allocation5 + $0xb20] sm:$0xff]  ;;  %v269_v12 = vld [vmem:[#allocation5 + $0x688] sm:$0xff] }
  0xb0   :  { %805 = vmatpush.msra.mxu0 %v71_v13  ;;  %846 = vmatpush.msra.mxu2 %v164_v62  ;;  %v320_v13 = vld [vmem:[#allocation5 + $0x820] sm:$0xff]  ;;  %v362_v62 = vld [vmem:[#allocation5 + $0x970] sm:$0xff] }
  0xb1   :  { %824 = vmatpush.msra.mxu1 %v122_v14  ;;  %865 = vmatpush.msra.mxu3 %v215_v15  ;;  %v413_v14 = vld [vmem:[#allocation5 + $0xb08] sm:$0xff]  ;;  %v266_v15 = vld [vmem:[#allocation5 + $0x670] sm:$0xff] }
  0xb2   :  { %806 = vmatpush.msra.mxu0 %v68_v16  ;;  %847 = vmatpush.msra.mxu2 %v161_v17  ;;  %v317_v16 = vld [vmem:[#allocation5 + $0x808] sm:$0xff]  ;;  %v359_v17 = vld [vmem:[#allocation5 + $0x958] sm:$0xff] }
  0xb3   :  { %825 = vmatpush.msra.mxu1 %v119_v19  ;;  %866 = vmatpush.msra.mxu3 %v212_v20  ;;  %v410_v19 = vld [vmem:[#allocation5 + $0xaf0] sm:$0xff]  ;;  %v988_v20 = vld.sshfl [vmem:[#allocation1 + $0x10] sm:$0xff pattern:$0x73625140] }
  0xb4   :  { %807 = vmatpush.msra.mxu0 %v65_v21  ;;  %848 = vmatpush.msra.mxu2 %v158_v22  ;;  %v263_v21 = vld [vmem:[#allocation5 + $0x658] sm:$0xff]  ;;  %v314_v22 = vld [vmem:[#allocation5 + $0x7f0] sm:$0xff] }
  0xb5   :  { %826 = vmatpush.msra.mxu1 %v116_v25  ;;  %867 = vmatpush.msra.mxu3 %v209_v26  ;;  %v356_v25 = vld [vmem:[#allocation5 + $0x940] sm:$0xff]  ;;  %v407_v26 = vld [vmem:[#allocation5 + $0xad8] sm:$0xff] }
  0xb6   :  { %913 = vmatpush.msrb.mxu2 %v395_v27  ;;  %808 = vmatpush.msra.mxu0 %v62_v28  ;;  %v260_v27 = vld [vmem:[#allocation5 + $0x640] sm:$0xff]  ;;  %v311_v28 = vld [vmem:[#allocation5 + $0x7d8] sm:$0xff] }
  0xb7   :  { %827 = vmatpush.msra.mxu1 %v113_v30  ;;  %868 = vmatpush.msra.mxu3 %v206_v31  ;;  %v353_v30 = vld [vmem:[#allocation5 + $0x928] sm:$0xff]  ;;  %v404_v31 = vld [vmem:[#allocation5 + $0xac0] sm:$0xff] }
  0xb8   :  { %873 = vmatpush.msrb.mxu0 %v299_v32  ;;  %914 = vmatpush.msrb.mxu2 %v392_v33  ;;  %v257_v32 = vld [vmem:[#allocation5 + $0x628] sm:$0xff]  ;;  %v308_v33 = vld [vmem:[#allocation5 + $0x7c0] sm:$0xff] }
  0xb9   :  { %933 = vmatpush.msrb.mxu3 %v443_v34  ;;  %828 = vmatpush.msra.mxu1 %v110_v35  ;;  %v350_v34 = vld [vmem:[#allocation5 + $0x910] sm:$0xff]  ;;  %v401_v35 = vld [vmem:[#allocation5 + $0xaa8] sm:$0xff] }
  0xba   :  { %874 = vmatpush.msrb.mxu0 %v296_v36  ;;  %915 = vmatpush.msrb.mxu2 %v389_v38  ;;  %v398_v36 = vld [vmem:[#allocation5 + $0xa90] sm:$0xff] }
  0xbb   :  { %893 = vmatpush.msrb.mxu1 %v347_v37  ;;  %934 = vmatpush.msrb.mxu3 %v440_v39  ;;  %v302_v37 = vld [vmem:[#allocation5 + $0x790] sm:$0xff] }
  0xbc   :  { %875 = vmatpush.msrb.mxu0 %v293_v40  ;;  %916 = vmatpush.msrb.mxu2 %v386_v42 }
  0xbd   :  { %894 = vmatpush.msrb.mxu1 %v344_v41  ;;  %935 = vmatpush.msrb.mxu3 %v437_v43 }
  0xbe   :  { %876 = vmatpush.msrb.mxu0 %v290_v44  ;;  %917 = vmatpush.msrb.mxu2 %v383_v46  ;;  %v444_v44 = vld [vmem:[#allocation7] sm:$0x7] }
  0xbf   :  { %895 = vmatpush.msrb.mxu1 %v341_v45  ;;  %936 = vmatpush.msrb.mxu3 %v434_v47 }
  0xc0   :  { %877 = vmatpush.msrb.mxu0 %v287_v48  ;;  %918 = vmatpush.msrb.mxu2 %v380_v50 }
  0xc1   :  { %896 = vmatpush.msrb.mxu1 %v338_v49  ;;  %937 = vmatpush.msrb.mxu3 %v431_v51  ;;  %v446_v49 = vperm.slane %v444_v44, 0 }
  0xc2   :  { %878 = vmatpush.msrb.mxu0 %v284_v52  ;;  %919 = vmatpush.msrb.mxu2 %v377_v54 }
  0xc3   :  { %897 = vmatpush.msrb.mxu1 %v335_v53  ;;  %938 = vmatpush.msrb.mxu3 %v428_v55 }
  0xc4   :  { %879 = vmatpush.msrb.mxu0 %v281_v56  ;;  %920 = vmatpush.msrb.mxu2 %v374_v58 }
  0xc5   :  { %898 = vmatpush.msrb.mxu1 %v332_v57  ;;  %939 = vmatpush.msrb.mxu3 %v425_v59  ;;  %v448_v57 = vperm.slane %v444_v44, 2 }
  0xc6   :  { %880 = vmatpush.msrb.mxu0 %v278_v60  ;;  %921 = vmatpush.msrb.mxu2 %v371_v63 }
  0xc7   :  { %899 = vmatpush.msrb.mxu1 %v329_v61  ;;  %940 = vmatpush.msrb.mxu3 %v422_v0 }
  0xc8   :  { %881 = vmatpush.msrb.mxu0 %v275_v1  ;;  %922 = vmatpush.msrb.mxu2 %v368_v5 }
  0xc9   :  { %900 = vmatpush.msrb.mxu1 %v326_v2  ;;  %941 = vmatpush.msrb.mxu3 %v419_v6 }
  0xca   :  { %882 = vmatpush.msrb.mxu0 %v272_v7  ;;  %923 = vmatpush.msrb.mxu2 %v365_v9 }
  0xcb   :  { %901 = vmatpush.msrb.mxu1 %v323_v8  ;;  %942 = vmatpush.msrb.mxu3 %v416_v11 }
  0xcc   :  { %883 = vmatpush.msrb.mxu0 %v269_v12  ;;  %924 = vmatpush.msrb.mxu2 %v362_v62 }
  0xcd   :  { %902 = vmatpush.msrb.mxu1 %v320_v13  ;;  %943 = vmatpush.msrb.mxu3 %v413_v14 }
  0xce   :  { %849 = vmatmul.f32.vlgmr.msra.gmra.mxu2 %v988_v20  ;;  %884 = vmatpush.msrb.mxu0 %v266_v15 }
  0xcf   :  { %903 = vmatpush.msrb.mxu1 %v317_v16  ;;  %925 = vmatpush.msrb.mxu2 %v359_v17 }
  0xd0   :  { %944 = vmatpush.msrb.mxu3 %v410_v19  ;;  %809 = vmatmul.f32.vlgmr.msra.gmra.mxu0 %v1128_v3  ;;  %v254_v3 = vld [vmem:[#allocation5 + $0x610] sm:$0xff] }
  0xd1   :  { %869 = vmatmul.f32.vlgmr.msra.gmra.mxu3 %v1131_v4  ;;  %885 = vmatpush.msrb.mxu0 %v263_v21  ;;  %v305_v4 = vld [vmem:[#allocation5 + $0x7a8] sm:$0xff]  ;;  %v510_v38 = vpop.f32.mrf.mxu1  ;;  %v530_v39 = vpop.f32.mrf.mxu2 }
  0xd2   :  { %904 = vmatpush.msrb.mxu1 %v314_v22  ;;  %926 = vmatpush.msrb.mxu2 %v356_v25 }
  0xd3   :  { %945 = vmatpush.msrb.mxu3 %v407_v26  ;;  %829 = vmatmul.f32.vlgmr.msra.gmra.mxu1 %v1135_v10  ;;  %v490_v10 = vpop.f32.mrf.mxu0 }
  0xd4   :  { %886 = vmatpush.msrb.mxu0 %v260_v27  ;;  %905 = vmatpush.msrb.mxu1 %v311_v28  ;;  %v550_v40 = vpop.f32.mrf.mxu3  ;;  %v491_v51 = vadd.f32 %v490_v10, %v446_v49 }
  0xd5   :  { %927 = vmatpush.msrb.mxu2 %v353_v30  ;;  %946 = vmatpush.msrb.mxu3 %v404_v31 }
  0xd6   :  { %887 = vmatpush.msrb.mxu0 %v257_v32  ;;  %906 = vmatpush.msrb.mxu1 %v308_v33  ;;  %v511_v53 = vadd.f32 %v510_v38, %v491_v51 }
  0xd7   :  { %928 = vmatpush.msrb.mxu2 %v350_v34  ;;  %947 = vmatpush.msrb.mxu3 %v401_v35 }
  0xd8   :  { %929 = vmatmul.f32.vlgmr.msrb.gmra.mxu2 %v1138_v18  ;;  %888 = vmatpush.msrb.mxu0 %v254_v3  ;;  %v447_v18 = vperm.slane %v444_v44, 1  ;;  %v531_v58 = vadd.f32 %v530_v39, %v511_v53 }
  0xd9   :  { %907 = vmatpush.msrb.mxu1 %v305_v4  ;;  %948 = vmatpush.msrb.mxu3 %v398_v36 }
  0xda   :  { %889 = vmatmul.f32.vlgmr.msrb.gmra.mxu0 %v1140_v23  ;;  %949 = vmatmul.f32.vlgmr.msrb.gmra.mxu3 %v1143_v24  ;;  %v590_v42 = vpop.f32.mrf.mxu1  ;;  %v551_v0 = vadd.f32 %v550_v40, %v531_v58 }
  0xdb   :  { %908 = vmatpush.msrb.mxu1 %v302_v37  ;;  %v570_v41 = vpop.f32.mrf.mxu0  ;;  %v610_v43 = vpop.f32.mrf.mxu2 }
  0xdc   :  { %909 = vmatmul.f32.vlgmr.msrb.gmra.mxu1 %v1146_v29  ;;  %v571_v7 = vadd.f32 %v570_v41, %v551_v0 }
  0xde   :  { %v630_v45 = vpop.f32.mrf.mxu3  ;;  %v591_v13 = vadd.f32 %v590_v42, %v571_v7 }
  0xe0   :  { %v611_v19 = vadd.f32 %v610_v43, %v591_v13 }
  0xe2   :  { %v631_v27 = vadd.f32 %v630_v45, %v611_v19 }
 0x109   :  { %v650_v46 = vpop.f32.mrf.mxu0 }
 0x10a   :  { %v651_v47 = vadd.f32 %v650_v46, %v447_v18 }
 0x10c   :  { %v670_v48 = vpop.f32.mrf.mxu1 }
 0x10d   :  { %v690_v23 = vpop.f32.mrf.mxu2  ;;  %v671_v50 = vadd.f32 %v670_v48, %v651_v47 }
 0x10f   :  { %v691_v52 = vadd.f32 %v690_v23, %v671_v50 }
 0x110   :  { %v710_v24 = vpop.f32.mrf.mxu3 }
 0x111   :  { %v711_v55 = vadd.f32 %v710_v24, %v691_v52 }
 0x113   :  { %v730_v29 = vpop.f32.mrf.mxu0 }
 0x114   :  { %v731_v60 = vadd.f32 %v730_v29, %v711_v55 }
 0x117   :  { %v750_v54 = vpop.f32.mrf.mxu1  ;;  %v770_v56 = vpop.f32.mrf.mxu2 }
 0x118   :  { %v751_v2 = vadd.f32 %v750_v54, %v731_v60 }
 0x11a   :  { %v790_v59 = vpop.f32.mrf.mxu3  ;;  %v771_v11 = vadd.f32 %v770_v56, %v751_v2 }
 0x11c   :  { %v791_v15 = vadd.f32 %v790_v59, %v771_v11 }
 0x11e   :  { %v956_v22 = vrot.slane %v791_v15, 6 }
 0x120   :  { %v959_v30 = vsel %vm958_vm0, %v631_v27, %v956_v22 }
 0x14d   :  { %v810_v61 = vpop.f32.mrf.mxu0 }
 0x14e   :  { %v811_v63 = vadd.f32 %v810_v61, %v448_v57 }
 0x150   :  { %v830_v1 = vpop.f32.mrf.mxu1 }
 0x151   :  { %v831_v5 = vadd.f32 %v830_v1, %v811_v63  ;;  %v850_v6 = vpop.f32.mrf.mxu2 }
 0x153   :  { %v851_v8 = vadd.f32 %v850_v6, %v831_v5 }
 0x154   :  { %v870_v9 = vpop.f32.mrf.mxu3 }
 0x155   :  { %v871_v12 = vadd.f32 %v870_v9, %v851_v8 }
 0x157   :  { %v890_v62 = vpop.f32.mrf.mxu0 }
 0x158   :  { %v891_v14 = vadd.f32 %v890_v62, %v871_v12 }
 0x159   :  { %v910_v16 = vpop.f32.mrf.mxu1 }
 0x15a   :  { %v911_v17 = vadd.f32 %v910_v16, %v891_v14 }
 0x15b   :  { %v930_v20 = vpop.f32.mrf.mxu2 }
 0x15c   :  { %v931_v21 = vadd.f32 %v930_v20, %v911_v17 }
 0x15d   :  { %v950_v25 = vpop.f32.mrf.mxu3 }
 0x15e   :  { %v951_v26 = vadd.f32 %v950_v25, %v931_v21 }
 0x160   :  { %v957_v28 = vrot.slane %v951_v26, 4 }
 0x162   :  { %v961_v31 = vsel %vm960_vm1, %v959_v30, %v957_v28 }
 0x163   :  { %963 = vst [vmem:[#allocation8] sm:$0x3f] %v961_v31 }
 0x164   :  { %974 = dma.vmem_to_hbm [thread:$0]  %s970_s2, 96, %s972_s30, [#allocation4]  }
 0x165   :  { %1089 = dma.done.wait [#allocation4], 96  }
 0x166   :  { %1090 = vsyncadd [#allocation4], 4294967200 }
 0x167   :  { %979 = vsyncpa [#allocation3], 1 }
 0x168   :  { %980 = vsyncpa [#allocation6], 1 }
 0x169   :  { %981 = vsyncpa [#allocation4], 1 }

</bundles_post_ra>
